<compile_context>
chip_gen: v7x
topology: tpu7x:2x2x1
jax: 0.10.0
libtpu: 0.0.40
codegen_flags: <defaults>
</compile_context>

<pallas_src>
import functools

import jax
import jax.numpy as jnp
from jax.experimental import pallas as pl
from jax.experimental.pallas import tpu as pltpu


def encoder_layer_kernel(
    x_ref,      # (bt, S, D)   f32   activations, natural layout
    wqkv_ref,   # (D, 3*HP)    bf16  [Wq | Wk | Wv], each column-padded to HP=128
    wo_ref,     # (HP, D)      bf16  attention output projection (bias=False)
    w2_ref,     # (D, D)       bf16  fc2 weight^T
    w1_ref,     # (D, D)       bf16  fc1 weight^T
    vec_ref,    # (8, D)       f32   rows: b2, b1, g1, be1, g2, be2, 0, 0
    out_ref,    # (bt, S, D)   f32
    *,
    seq_len: int,
    dim_attn: int,
    dim_val: int,
    head_pad: int,
):
    S, D, HP = seq_len, dim_val, head_pad
    Bt = x_ref.shape[0]
    M = Bt * S

    # Fold the batch tile into the matmul M dimension.  All element-wise math
    # below happens at the native D-lane width (no pad lanes, no masks).
    x = x_ref[...].reshape(M, D)                     # (M, D) f32
    x_b = x.astype(jnp.bfloat16)

    vecs = vec_ref[...]                              # (8, D) f32
    b2, b1 = vecs[0:1], vecs[1:2]
    g1, be1 = vecs[2:3], vecs[3:4]
    g2, be2 = vecs[4:5], vecs[5:6]

    # ---- fused single-head QKV projection (bf16 MXU operands, f32 acc) ----
    qkv = jnp.dot(x_b, wqkv_ref[...],
                  preferred_element_type=jnp.float32)          # (M, 3*HP) f32
    qkv = qkv.astype(jnp.bfloat16)                             # single downcast pass
    # Slices land on 128-lane boundaries -> no lane shifts.
    q3 = qkv[:, 0 * HP:1 * HP].reshape(Bt, S, HP)
    k3 = qkv[:, 1 * HP:2 * HP].reshape(Bt, S, HP)
    v3 = qkv[:, 2 * HP:3 * HP].reshape(Bt, S, HP)

    scale = 1.0 / float(dim_attn) ** 0.5
    # Batched contraction over the (padded, zero-filled) attention dim.
    s = jnp.einsum("bqd,bkd->bqk", q3, k3,
                   preferred_element_type=jnp.float32) * scale  # (Bt, S, S)
    s = s - jnp.max(s, axis=-1, keepdims=True)
    p = jnp.exp(s)
    p = p / jnp.sum(p, axis=-1, keepdims=True)       # exact reciprocal (cheap)
    # TODO(synk): if S is ever scaled up, tile KV with an online softmax instead
    # of materializing the full (S, S) score block (and raise vmem_limit_bytes).

    head = jnp.einsum("bqk,bkd->bqd", p.astype(jnp.bfloat16), v3,
                      preferred_element_type=jnp.float32)       # (Bt, S, HP)
    a = jnp.dot(head.reshape(M, HP).astype(jnp.bfloat16), wo_ref[...],
                preferred_element_type=jnp.float32)             # (M, D)

    # ---- LayerNorm over the real D features (biased variance, eps=1e-5) ----
    inv_d = 1.0 / float(D)

    def layer_norm(h, g, b):
        mu = jnp.sum(h, axis=-1, keepdims=True) * inv_d
        c = h - mu
        var = jnp.sum(c * c, axis=-1, keepdims=True) * inv_d
        return c * jax.lax.rsqrt(var + 1e-5) * g + b

    h1 = layer_norm(x + a, g1, be1)                             # (M, D)

    # ---- feed-forward: fc1(relu(fc2(x))) ----
    ff = jnp.dot(h1.astype(jnp.bfloat16), w2_ref[...],
                 preferred_element_type=jnp.float32) + b2
    ff = jnp.maximum(ff, 0.0)
    ff = jnp.dot(ff.astype(jnp.bfloat16), w1_ref[...],
                 preferred_element_type=jnp.float32) + b1

    out = layer_norm(h1 + ff, g2, be2)                          # (M, D)
    out_ref[...] = out.reshape(Bt, S, D).astype(out_ref.dtype)


def _pick_batch_tile(batch, seq):
    """Batch elements folded into one grid step (rows = bt*seq in the matmul M dim).

    Policy (per perf review):
      * One fat grid step whenever the whole batch is <= MAX_ROWS rows: at small
        B*S the ~600-cycle per-step pipeline overhead dominates and splitting
        only starves the MXU (v5e/v6e are single-TC; on v7x splitting 16 rows
        across two TensorCores is pure overhead).
      * Otherwise aim for ~MAX_ROWS rows per step and never drop below
        MIN_SPLIT_ROWS per step; a ragged last tile is handled with a
        cdiv grid + one-time batch pad in the wrapper (no divisor shrinking).
    """
    MAX_ROWS = 2048          # per-step cap: amortizes overhead, stays well under
                             # v7x's 64 MiB physical / 32 MiB scoped-default VMEM
    MIN_SPLIT_ROWS = 512     # below this, per-step overhead dominates
    if batch * seq <= MAX_ROWS:
        return batch
    bt = max(1, min(batch, MAX_ROWS // seq))
    bt = max(bt, min(batch, -(-MIN_SPLIT_ROWS // seq)))
    return bt


def encoder_layer(x, params, *, dim_attn):
    """x: [B, S, dim_val] float32. params: dict of bf16 weights (see init_params)."""
    B, S, D = x.shape
    HP = params["wo"].shape[0]               # padded head width (128)

    bt = _pick_batch_tile(B, S)
    steps = pl.cdiv(B, bt)
    Bp = steps * bt
    # Only pads when B is not a multiple of bt (never for the demo shapes).
    x_in = x if Bp == B else jnp.pad(x, ((0, Bp - B), (0, 0), (0, 0)))

    kernel = functools.partial(
        encoder_layer_kernel,
        seq_len=S, dim_attn=dim_attn, dim_val=D, head_pad=HP)

    # Grid-invariant weights: same block index every step -> DMA'd once.
    const = lambda r, c: pl.BlockSpec((r, c), lambda i: (0, 0))
    # Natural-layout activation block: last two dims equal the full array dims,
    # so the (8,128) divisibility rule is satisfied without any wrapper pad.
    act_spec = pl.BlockSpec((bt, S, D), lambda i: (i, 0, 0))

    out = pl.pallas_call(
        kernel,
        out_shape=jax.ShapeDtypeStruct((Bp, S, D), x.dtype),
        grid_spec=pltpu.PrefetchScalarGridSpec(
            num_scalar_prefetch=0,
            grid=(steps,),
            in_specs=[
                act_spec,            # x
                const(D, 3 * HP),    # fused [Wq | Wk | Wv]
                const(HP, D),        # Wo
                const(D, D),         # W2 (fc2)
                const(D, D),         # W1 (fc1)
                const(8, D),         # fused vectors (b2,b1,g1,be1,g2,be2)
            ],
            out_specs=act_spec,
        ),
        compiler_params=pltpu.CompilerParams(
            dimension_semantics=("parallel",)),
    )(x_in, params["wqkv"], params["wo"], params["w2"], params["w1"],
      params["vecs"])

    return out if Bp == B else out[:B]


def init_params(key, dim_val, dim_attn, head_pad=128):
    """Deterministic synthetic parameters.

    Weights are stored pre-transposed (x @ W layout) in bf16.  Wq/Wk/Wv are
    column-zero-padded to `head_pad` lanes and concatenated so the kernel's
    fused projection result can be sliced at 128-lane boundaries; Wo is
    row-padded to match.  fc1/fc2/LayerNorm parameters stay at native width.
    """
    D, A, HP = dim_val, dim_attn, head_pad
    ks = jax.random.split(key, 8)
    sc = 0.1

    wq = sc * jax.random.normal(ks[0], (D, A), jnp.float32)   # Query (no bias)
    wk = sc * jax.random.normal(ks[1], (D, A), jnp.float32)   # Key   (no bias)
    wv = sc * jax.random.normal(ks[2], (D, D), jnp.float32)   # Value (no bias)
    wo = sc * jax.random.normal(ks[3], (D, D), jnp.float32)   # MHA fc (no bias)
    w1 = sc * jax.random.normal(ks[4], (D, D), jnp.float32)   # fc1
    b1 = sc * jax.random.normal(ks[5], (D,), jnp.float32)
    w2 = sc * jax.random.normal(ks[6], (D, D), jnp.float32)   # fc2
    b2 = sc * jax.random.normal(ks[7], (D,), jnp.float32)

    def pad_cols(w, cols):
        return jnp.pad(w, ((0, 0), (0, cols - w.shape[1])))

    wqkv = jnp.concatenate(
        [pad_cols(wq, HP), pad_cols(wk, HP), pad_cols(wv, HP)], axis=1)  # (D, 3*HP)
    wo_p = jnp.pad(wo, ((0, HP - D), (0, 0)))                            # (HP, D)

    vecs = jnp.zeros((8, D), jnp.float32)
    vecs = vecs.at[0].set(b2).at[1].set(b1)
    vecs = vecs.at[2].set(jnp.ones((D,)))        # norm1 gamma
    vecs = vecs.at[4].set(jnp.ones((D,)))        # norm2 gamma
    # rows 3, 5 (betas) stay zero; rows 6, 7 unused padding to a full sublane tile.

    return {
        "wqkv": wqkv.astype(jnp.bfloat16),
        "wo": wo_p.astype(jnp.bfloat16),
        "w2": w2.astype(jnp.bfloat16),
        "w1": w1.astype(jnp.bfloat16),
        "vecs": vecs,
    }


def encoder_layer_ref(x, p, *, dim_attn, dim_val):
    """Pure-JAX f32 reference (same bf16-stored weights, upcast) matching PyTorch."""
    D, A = dim_val, dim_attn
    HP = p["wo"].shape[0]
    wq = p["wqkv"][:, 0:A].astype(jnp.float32)
    wk = p["wqkv"][:, HP:HP + A].astype(jnp.float32)
    wv = p["wqkv"][:, 2 * HP:2 * HP + D].astype(jnp.float32)
    wo = p["wo"][:D, :D].astype(jnp.float32)
    w2 = p["w2"].astype(jnp.float32)
    w1 = p["w1"].astype(jnp.float32)
    b2, b1, g1, be1, g2, be2 = (p["vecs"][i] for i in range(6))

    q, k, v = x @ wq, x @ wk, x @ wv
    s = (q @ jnp.swapaxes(k, -1, -2)) / jnp.sqrt(jnp.float32(A))
    a = (jax.nn.softmax(s, axis=-1) @ v) @ wo

    def ln(h, g, b):
        mu = h.mean(-1, keepdims=True)
        var = ((h - mu) ** 2).mean(-1, keepdims=True)
        return (h - mu) / jnp.sqrt(var + 1e-5) * g + b

    h1 = ln(x + a, g1, be1)
    ff = jnp.maximum(h1 @ w2 + b2, 0.0) @ w1 + b1
    return ln(h1 + ff, g2, be2)


if __name__ == "__main__":
    B, S = 2, 8
    dim_val, dim_attn = 32, 16

    key = jax.random.PRNGKey(0)
    kx, kp = jax.random.split(key)
    x = jax.random.normal(kx, (B, S, dim_val), jnp.float32)
    params = init_params(kp, dim_val, dim_attn)

    out = encoder_layer(x, params, dim_attn=dim_attn)
    out = jax.block_until_ready(out)

    ref = encoder_layer_ref(x, params, dim_attn=dim_attn, dim_val=dim_val)
    assert out.shape == (B, S, dim_val)
    max_err = float(jnp.max(jnp.abs(out - ref)))
    # bf16 MXU operands (f32 accumulation) vs the f32 reference -> relaxed tol.
    assert jnp.allclose(out, ref, atol=3e-2, rtol=3e-2), f"mismatch vs ref: {max_err}"

    print("KERNEL_OK")
</pallas_src>

<mosaic_0001>
module attributes {stable_mosaic.version = 11 : i64} {
  func.func @encoder_layer_kernel(%arg0: i32, %arg1: memref<2x8x32xf32, #tpu.memory_space<vmem>>, %arg2: memref<32x384xbf16, #tpu.memory_space<vmem>>, %arg3: memref<128x32xbf16, #tpu.memory_space<vmem>>, %arg4: memref<32x32xbf16, #tpu.memory_space<vmem>>, %arg5: memref<32x32xbf16, #tpu.memory_space<vmem>>, %arg6: memref<8x32xf32, #tpu.memory_space<vmem>>, %arg7: memref<2x8x32xf32, #tpu.memory_space<vmem>>) attributes {dimension_semantics = [#tpu.dimension_semantics<parallel>], iteration_bounds = array<i64: 1>, scalar_prefetch = 0 : i64, scratch_operands = 0 : i64, tpu.core_type = #tpu.core_type<tc>, window_params = [{transform_indices = @transform_0, window_bounds = array<i64: 2, 8, 32>}, {pipeline_mode = #tpu.pipeline_mode<synchronous>, transform_indices = @transform_1, window_bounds = array<i64: 32, 384>}, {pipeline_mode = #tpu.pipeline_mode<synchronous>, transform_indices = @transform_2, window_bounds = array<i64: 128, 32>}, {pipeline_mode = #tpu.pipeline_mode<synchronous>, transform_indices = @transform_3, window_bounds = array<i64: 32, 32>}, {pipeline_mode = #tpu.pipeline_mode<synchronous>, transform_indices = @transform_4, window_bounds = array<i64: 32, 32>}, {pipeline_mode = #tpu.pipeline_mode<synchronous>, transform_indices = @transform_5, window_bounds = array<i64: 8, 32>}, {transform_indices = @transform_6, window_bounds = array<i64: 2, 8, 32>}]} {
    %c0 = arith.constant 0 : index
    %c0_0 = arith.constant 0 : index
    %c0_1 = arith.constant 0 : index
    %0 = vector.load %arg1[%c0, %c0_0, %c0_1] : memref<2x8x32xf32, #tpu.memory_space<vmem>>, vector<2x8x32xf32>
    %1 = vector.shape_cast %0 : vector<2x8x32xf32> to vector<16x32xf32>
    %2 = arith.truncf %1 : vector<16x32xf32> to vector<16x32xbf16>
    %c0_2 = arith.constant 0 : index
    %c0_3 = arith.constant 0 : index
    %3 = vector.load %arg6[%c0_2, %c0_3] : memref<8x32xf32, #tpu.memory_space<vmem>>, vector<8x32xf32>
    %4 = vector.extract_strided_slice %3 {offsets = [0, 0], sizes = [1, 32], strides = [1, 1]} : vector<8x32xf32> to vector<1x32xf32>
    %5 = vector.extract_strided_slice %3 {offsets = [1, 0], sizes = [1, 32], strides = [1, 1]} : vector<8x32xf32> to vector<1x32xf32>
    %6 = vector.extract_strided_slice %3 {offsets = [2, 0], sizes = [1, 32], strides = [1, 1]} : vector<8x32xf32> to vector<1x32xf32>
    %7 = vector.extract_strided_slice %3 {offsets = [3, 0], sizes = [1, 32], strides = [1, 1]} : vector<8x32xf32> to vector<1x32xf32>
    %8 = vector.extract_strided_slice %3 {offsets = [4, 0], sizes = [1, 32], strides = [1, 1]} : vector<8x32xf32> to vector<1x32xf32>
    %9 = vector.extract_strided_slice %3 {offsets = [5, 0], sizes = [1, 32], strides = [1, 1]} : vector<8x32xf32> to vector<1x32xf32>
    %c0_4 = arith.constant 0 : index
    %c0_5 = arith.constant 0 : index
    %10 = vector.load %arg2[%c0_4, %c0_5] : memref<32x384xbf16, #tpu.memory_space<vmem>>, vector<32x384xbf16>
    %cst = arith.constant dense<0.000000e+00> : vector<16x384xf32>
    %11 = tpu.matmul %2, %10, %cst {dimension_numbers = #tpu.dot_dimension_numbers<[1], [0], [0], [1], [0, 0, 1, 1], [], []>} : vector<16x32xbf16>, vector<32x384xbf16>, vector<16x384xf32> -> vector<16x384xf32>
    %12 = arith.truncf %11 : vector<16x384xf32> to vector<16x384xbf16>
    %13 = vector.extract_strided_slice %12 {offsets = [0, 0], sizes = [16, 128], strides = [1, 1]} : vector<16x384xbf16> to vector<16x128xbf16>
    %14 = vector.shape_cast %13 : vector<16x128xbf16> to vector<2x8x128xbf16>
    %15 = vector.extract_strided_slice %12 {offsets = [0, 128], sizes = [16, 128], strides = [1, 1]} : vector<16x384xbf16> to vector<16x128xbf16>
    %16 = vector.shape_cast %15 : vector<16x128xbf16> to vector<2x8x128xbf16>
    %17 = vector.extract_strided_slice %12 {offsets = [0, 256], sizes = [16, 128], strides = [1, 1]} : vector<16x384xbf16> to vector<16x128xbf16>
    %18 = vector.shape_cast %17 : vector<16x128xbf16> to vector<2x8x128xbf16>
    "tpu.trace_start"() <{level = 10 : i32, message = "bqd,bkd->bqk"}> : () -> ()
    %cst_6 = arith.constant dense<0.000000e+00> : vector<2x8x8xf32>
    %19 = tpu.matmul %14, %16, %cst_6 {dimension_numbers = #tpu.dot_dimension_numbers<[2], [2], [1], [1], [0, 0, 0, 1, 1, 1], [0], [0]>} : vector<2x8x128xbf16>, vector<2x8x128xbf16>, vector<2x8x8xf32> -> vector<2x8x8xf32>
    "tpu.trace_stop"() : () -> ()
    %cst_7 = arith.constant 2.500000e-01 : f32
    %20 = vector.broadcast %cst_7 : f32 to vector<2x8x8xf32>
    %21 = arith.mulf %19, %20 : vector<2x8x8xf32>
    %cst_8 = arith.constant dense<0xFF800000> : vector<2x8xf32>
    %22 = vector.multi_reduction <maximumf>, %21, %cst_8 [2] : vector<2x8x8xf32> to vector<2x8xf32>
    %23 = vector.shape_cast %22 : vector<2x8xf32> to vector<2x8x1xf32>
    %24 = vector.broadcast %23 : vector<2x8x1xf32> to vector<2x8x8xf32>
    %25 = arith.subf %21, %24 : vector<2x8x8xf32>
    %26 = math.exp %25 : vector<2x8x8xf32>
    %cst_9 = arith.constant dense<0.000000e+00> : vector<2x8xf32>
    %27 = vector.multi_reduction <add>, %26, %cst_9 [2] : vector<2x8x8xf32> to vector<2x8xf32>
    %28 = vector.shape_cast %27 : vector<2x8xf32> to vector<2x8x1xf32>
    %29 = vector.broadcast %28 : vector<2x8x1xf32> to vector<2x8x8xf32>
    %30 = arith.divf %26, %29 : vector<2x8x8xf32>
    %31 = arith.truncf %30 : vector<2x8x8xf32> to vector<2x8x8xbf16>
    "tpu.trace_start"() <{level = 10 : i32, message = "bqk,bkd->bqd"}> : () -> ()
    %cst_10 = arith.constant dense<0.000000e+00> : vector<2x8x128xf32>
    %32 = tpu.matmul %31, %18, %cst_10 {dimension_numbers = #tpu.dot_dimension_numbers<[2], [1], [1], [2], [0, 0, 0, 1, 1, 2], [0], [0]>} : vector<2x8x8xbf16>, vector<2x8x128xbf16>, vector<2x8x128xf32> -> vector<2x8x128xf32>
    "tpu.trace_stop"() : () -> ()
    %33 = vector.shape_cast %32 : vector<2x8x128xf32> to vector<16x128xf32>
    %34 = arith.truncf %33 : vector<16x128xf32> to vector<16x128xbf16>
    %c0_11 = arith.constant 0 : index
    %c0_12 = arith.constant 0 : index
    %35 = vector.load %arg3[%c0_11, %c0_12] : memref<128x32xbf16, #tpu.memory_space<vmem>>, vector<128x32xbf16>
    %cst_13 = arith.constant dense<0.000000e+00> : vector<16x32xf32>
    %36 = tpu.matmul %34, %35, %cst_13 {dimension_numbers = #tpu.dot_dimension_numbers<[1], [0], [0], [1], [0, 0, 1, 1], [], []>} : vector<16x128xbf16>, vector<128x32xbf16>, vector<16x32xf32> -> vector<16x32xf32>
    %37 = arith.addf %1, %36 : vector<16x32xf32>
    %cst_14 = arith.constant dense<0.000000e+00> : vector<16xf32>
    %38 = vector.multi_reduction <add>, %37, %cst_14 [1] : vector<16x32xf32> to vector<16xf32>
    %39 = vector.shape_cast %38 : vector<16xf32> to vector<16x1xf32>
    %cst_15 = arith.constant 3.125000e-02 : f32
    %40 = vector.broadcast %cst_15 : f32 to vector<16x1xf32>
    %41 = arith.mulf %39, %40 : vector<16x1xf32>
    %42 = vector.broadcast %41 : vector<16x1xf32> to vector<16x32xf32>
    %43 = arith.subf %37, %42 : vector<16x32xf32>
    %44 = arith.mulf %43, %43 : vector<16x32xf32>
    %cst_16 = arith.constant dense<0.000000e+00> : vector<16xf32>
    %45 = vector.multi_reduction <add>, %44, %cst_16 [1] : vector<16x32xf32> to vector<16xf32>
    %46 = vector.shape_cast %45 : vector<16xf32> to vector<16x1xf32>
    %cst_17 = arith.constant 3.125000e-02 : f32
    %47 = vector.broadcast %cst_17 : f32 to vector<16x1xf32>
    %48 = arith.mulf %46, %47 : vector<16x1xf32>
    %cst_18 = arith.constant 9.99999974E-6 : f32
    %49 = vector.broadcast %cst_18 : f32 to vector<16x1xf32>
    %50 = arith.addf %48, %49 : vector<16x1xf32>
    %51 = math.rsqrt %50 : vector<16x1xf32>
    %52 = vector.broadcast %51 : vector<16x1xf32> to vector<16x32xf32>
    %53 = arith.mulf %43, %52 : vector<16x32xf32>
    %54 = vector.broadcast %6 : vector<1x32xf32> to vector<16x32xf32>
    %55 = arith.mulf %53, %54 : vector<16x32xf32>
    %56 = vector.broadcast %7 : vector<1x32xf32> to vector<16x32xf32>
    %57 = arith.addf %55, %56 : vector<16x32xf32>
    %58 = arith.truncf %57 : vector<16x32xf32> to vector<16x32xbf16>
    %c0_19 = arith.constant 0 : index
    %c0_20 = arith.constant 0 : index
    %59 = vector.load %arg4[%c0_19, %c0_20] : memref<32x32xbf16, #tpu.memory_space<vmem>>, vector<32x32xbf16>
    %cst_21 = arith.constant dense<0.000000e+00> : vector<16x32xf32>
    %60 = tpu.matmul %58, %59, %cst_21 {dimension_numbers = #tpu.dot_dimension_numbers<[1], [0], [0], [1], [0, 0, 1, 1], [], []>} : vector<16x32xbf16>, vector<32x32xbf16>, vector<16x32xf32> -> vector<16x32xf32>
    %61 = vector.broadcast %4 : vector<1x32xf32> to vector<16x32xf32>
    %62 = arith.addf %60, %61 : vector<16x32xf32>
    %cst_22 = arith.constant 0.000000e+00 : f32
    %63 = vector.broadcast %cst_22 : f32 to vector<16x32xf32>
    %64 = arith.maximumf %62, %63 : vector<16x32xf32>
    %65 = arith.truncf %64 : vector<16x32xf32> to vector<16x32xbf16>
    %c0_23 = arith.constant 0 : index
    %c0_24 = arith.constant 0 : index
    %66 = vector.load %arg5[%c0_23, %c0_24] : memref<32x32xbf16, #tpu.memory_space<vmem>>, vector<32x32xbf16>
    %cst_25 = arith.constant dense<0.000000e+00> : vector<16x32xf32>
    %67 = tpu.matmul %65, %66, %cst_25 {dimension_numbers = #tpu.dot_dimension_numbers<[1], [0], [0], [1], [0, 0, 1, 1], [], []>} : vector<16x32xbf16>, vector<32x32xbf16>, vector<16x32xf32> -> vector<16x32xf32>
    %68 = vector.broadcast %5 : vector<1x32xf32> to vector<16x32xf32>
    %69 = arith.addf %67, %68 : vector<16x32xf32>
    %70 = arith.addf %57, %69 : vector<16x32xf32>
    %cst_26 = arith.constant dense<0.000000e+00> : vector<16xf32>
    %71 = vector.multi_reduction <add>, %70, %cst_26 [1] : vector<16x32xf32> to vector<16xf32>
    %72 = vector.shape_cast %71 : vector<16xf32> to vector<16x1xf32>
    %cst_27 = arith.constant 3.125000e-02 : f32
    %73 = vector.broadcast %cst_27 : f32 to vector<16x1xf32>
    %74 = arith.mulf %72, %73 : vector<16x1xf32>
    %75 = vector.broadcast %74 : vector<16x1xf32> to vector<16x32xf32>
    %76 = arith.subf %70, %75 : vector<16x32xf32>
    %77 = arith.mulf %76, %76 : vector<16x32xf32>
    %cst_28 = arith.constant dense<0.000000e+00> : vector<16xf32>
    %78 = vector.multi_reduction <add>, %77, %cst_28 [1] : vector<16x32xf32> to vector<16xf32>
    %79 = vector.shape_cast %78 : vector<16xf32> to vector<16x1xf32>
    %cst_29 = arith.constant 3.125000e-02 : f32
    %80 = vector.broadcast %cst_29 : f32 to vector<16x1xf32>
    %81 = arith.mulf %79, %80 : vector<16x1xf32>
    %cst_30 = arith.constant 9.99999974E-6 : f32
    %82 = vector.broadcast %cst_30 : f32 to vector<16x1xf32>
    %83 = arith.addf %81, %82 : vector<16x1xf32>
    %84 = math.rsqrt %83 : vector<16x1xf32>
    %85 = vector.broadcast %84 : vector<16x1xf32> to vector<16x32xf32>
    %86 = arith.mulf %76, %85 : vector<16x32xf32>
    %87 = vector.broadcast %8 : vector<1x32xf32> to vector<16x32xf32>
    %88 = arith.mulf %86, %87 : vector<16x32xf32>
    %89 = vector.broadcast %9 : vector<1x32xf32> to vector<16x32xf32>
    %90 = arith.addf %88, %89 : vector<16x32xf32>
    %91 = vector.shape_cast %90 : vector<16x32xf32> to vector<2x8x32xf32>
    %c0_31 = arith.constant 0 : index
    %c0_32 = arith.constant 0 : index
    %c0_33 = arith.constant 0 : index
    %92 = vector.load %arg7[%c0_31, %c0_32, %c0_33] : memref<2x8x32xf32, #tpu.memory_space<vmem>>, vector<2x8x32xf32>
    tpu.vector_store %arg7[%c0_31, %c0_32, %c0_33], %91 {strides = array<i32>} : memref<2x8x32xf32, #tpu.memory_space<vmem>>, vector<2x8x32xf32>,
    return
  }
  func.func @transform_0(%arg0: i32) -> (i32, i32, i32) {
    %c0_i32 = arith.constant 0 : i32
    %c0_i32_0 = arith.constant 0 : i32
    %c0_i32_1 = arith.constant 0 : i32
    return %arg0, %c0_i32, %c0_i32_0 : i32, i32, i32
  }
  func.func @transform_1(%arg0: i32) -> (i32, i32) {
    %c0_i32 = arith.constant 0 : i32
    %c0_i32_0 = arith.constant 0 : i32
    %c0_i32_1 = arith.constant 0 : i32
    return %c0_i32, %c0_i32_0 : i32, i32
  }
  func.func @transform_2(%arg0: i32) -> (i32, i32) {
    %c0_i32 = arith.constant 0 : i32
    %c0_i32_0 = arith.constant 0 : i32
    %c0_i32_1 = arith.constant 0 : i32
    return %c0_i32, %c0_i32_0 : i32, i32
  }
  func.func @transform_3(%arg0: i32) -> (i32, i32) {
    %c0_i32 = arith.constant 0 : i32
    %c0_i32_0 = arith.constant 0 : i32
    %c0_i32_1 = arith.constant 0 : i32
    return %c0_i32, %c0_i32_0 : i32, i32
  }
  func.func @transform_4(%arg0: i32) -> (i32, i32) {
    %c0_i32 = arith.constant 0 : i32
    %c0_i32_0 = arith.constant 0 : i32
    %c0_i32_1 = arith.constant 0 : i32
    return %c0_i32, %c0_i32_0 : i32, i32
  }
  func.func @transform_5(%arg0: i32) -> (i32, i32) {
    %c0_i32 = arith.constant 0 : i32
    %c0_i32_0 = arith.constant 0 : i32
    %c0_i32_1 = arith.constant 0 : i32
    return %c0_i32, %c0_i32_0 : i32, i32
  }
  func.func @transform_6(%arg0: i32) -> (i32, i32, i32) {
    %c0_i32 = arith.constant 0 : i32
    %c0_i32_0 = arith.constant 0 : i32
    %c0_i32_1 = arith.constant 0 : i32
    return %arg0, %c0_i32, %c0_i32_0 : i32, i32, i32
  }
}

</mosaic_0001>

<bundles_post_ra>
// kernel: tpu_custom_call.1
= control target key start
LH: loop header
LB: loop body
LE: loop exit
PB: predicated region body
PF: predicated region fallthrough
CT: control target
= control target key end

     0   :  { %11 = vsyncpa [#allocation3], 0  ;;  %s1156_s0 = inlined_call_operand.vmem [shape: f32[2,8,32], index: 0, kind: input, shape index: {}]   ;;  %s1157_s1 = inlined_call_operand.vmem [shape: bf16[32,384], index: 1, kind: input, shape index: {}]   ;;  %s1158_s2 = inlined_call_operand.vmem [shape: bf16[128,32], index: 2, kind: input, shape index: {}]   ;;  %s1159_s3 = inlined_call_operand.vmem [shape: bf16[32,32], index: 3, kind: input, shape index: {}]   ;;  %s1160_s4 = inlined_call_operand.hbm [shape: bf16[32,32], index: 4, kind: input, shape index: {}]   ;;  %s1161_s5 = inlined_call_operand.vmem [shape: f32[8,32], index: 5, kind: input, shape index: {}]   ;;  %s1162_s6 = inlined_call_operand.hbm [shape: f32[2,8,32], index: 6, kind: output, shape index: {}]  }
   0x1   :  { %12 = vsyncpa [#allocation4], 0  ;;  %s953_s21 = smov [#allocation2]   ;;  %s905_s25 = scalar_lea.hbm %s1160_s4, 256 }
   0x2   :  { %s26_s22 = sshll.u32 %s953_s21, 4  ;;  %p906_p0 = scmp.ne.s32.totalorder %s1160_s4, %s905_s25  ;;  %s27_s22 = int_to_ptr.vmem [resolvable:$true] %s26_s22 }
   0x3   :  { %p909_p1 = scmp.lt.u32.totalorder %s905_s25, %s1160_s4 }
   0x5   :  { %p911_p2 = pnand %p909_p1, %p906_p0 }
   0x7   :  { %914 = shalt.err (!%p911_p2)
}
   0x8   :  { %s915_s30 = scalar_lea.vmem %s27_s22, 256  ;;  %p920_p4 = scmp.lt.s32.totalorder %s27_s22, %s27_s22 }
   0x9   :  { %p916_p3 = scmp.ne.s32.totalorder %s27_s22, %s915_s30  ;;  %p921_p5 = scmp.lt.s32.totalorder %s915_s30, %s915_s30 }
   0xb   :  { %p922_p6 = por %p921_p5, %p920_p4 }
   0xd   :  { %p923_p7 = pnand %p922_p6, %p916_p3 }
   0xf   :  { %926 = shalt.err (!%p923_p7)
}
  0x10   :  { %s954_s7 = smov 64   ;;  %s955_s8 = smov 4  }
  0x11   :  { %32 = dma.hbm_to_vmem [thread:$0]  %s1160_s4, 256, %s27_s22, [#allocation3], %s954_s7, %s954_s7, %s955_s8  }
  0x12   :  { %949 = dma.done.wait [#allocation3], 256  }
  0x13   :  { %950 = vsyncadd [#allocation3], 4294967040  ;;  %v956_v0 = vmov 0   ;;  %v957_v1 = vmov 0.0   ;;  %v869_v2 = vld [vmem:[%s1157_s1 + $0x4] ss:$12 sps:$4 sm:$0xff]  }
  0x14   :  { %119 = vmatprep.mubr.bf16.mxu1 %v956_v0  ;;  %800 = vmatprep.subr.bf16.mxu0 %v957_v1  ;;  %v871_v3 = vld [vmem:[%s1157_s1] ss:$12 sps:$4 sm:$0xff]   ;;  %v872_v4 = vld [vmem:[%s1157_s1 + $0x1c] ss:$12 sps:$4 sm:$0xff]   ;;  %v874_v5 = vld [vmem:[%s1157_s1 + $0x18] ss:$12 sps:$4 sm:$0xff]  }
  0x15   :  { %87 = vmatprep.subr.bf16.mxu1 %v869_v2  ;;  %v1025_v6 = vld [vmem:[%s1156_s0] sm:$0xff]  ;;  %v1030_v7 = vld [vmem:[%s1156_s0 + $0x8] sm:$0xff]  ;;  %vm83_vm0 = vcmask 261120   ;;  %vm958_vm1 = vmmov 0   ;;  %vm303_vm2 = vcmask 1043456   ;;  %vm275_vm3 = vcmask 64512  }
  0x16   :  { %88 = vmatpush1.bf16.msra.mxu1 %v871_v3  ;;  %v875_v8 = vld [vmem:[%s1157_s1 + $0x8] ss:$12 sps:$4 sm:$0xff]   ;;  %v41_v9 = vpack.c.bf16 %v1030_v7, %v1025_v6  ;;  %v876_v10 = vld [vmem:[%s1157_s1 + $0x20] ss:$12 sps:$4 sm:$0xff]   ;;  %802 = vmatprep.mubr.msk.bf16.mxu0 %vm958_vm1, %v957_v1  ;;  %v880_v60 = vld [vmem:[%s1158_s2 + $0x18] sm:$0xff]  }
  0x17   :  { %89 = vmatprep.subr.bf16.mxu1 %v872_v4  ;;  %v877_v53 = vld [vmem:[%s1158_s2] sm:$0xff]   ;;  %v878_v57 = vld [vmem:[%s1158_s2 + $0x8] sm:$0xff]   ;;  %v879_v59 = vld [vmem:[%s1158_s2 + $0x10] sm:$0xff]  }
  0x18   :  { %v881_v61 = vld [vmem:[%s1158_s2 + $0x20] sm:$0xff]   ;;  %v882_v62 = vld [vmem:[%s1158_s2 + $0x28] sm:$0xff]   ;;  %v883_v63 = vld [vmem:[%s1158_s2 + $0x30] sm:$0xff]  }
  0x19   :  { %v884_v0 = vld [vmem:[%s1158_s2 + $0x38] sm:$0xff]  }
  0x1a   :  { %90 = vmatpush1.bf16.msra.mxu1 %v874_v5 }
  0x1b   :  { %792 = vmatprep.subr.bf16.mxu1 %v957_v1 }
  0x1d   :  { %736 = vmatmul.mubr.msk.bf16.vlgmr.msra.gmra.mrb[0].mxu1 %vm83_vm0, %v41_v9 }
  0x1e   :  { %793 = vmatpush3.bf16.msra.mxu1 %v875_v8  ;;  %796 = vmatprep.mubr.msk.bf16.mxu1 %vm958_vm1, %v957_v1 }
  0x1f   :  { %794 = vmatprep.subr.bf16.mxu1 %v957_v1 }
  0x22   :  { %795 = vmatpush3.bf16.msra.mxu1 %v876_v10 }
  0x23   :  { %806 = vmatprep.subr.bf16.mxu1 %v957_v1 }
  0x25   :  { %797 = vmatmul.mubr.msk.bf16.vlgmr.msra.gmra.mrb[4].mxu1 %vm83_vm0, %v41_v9 }
  0x26   :  { %808 = vmatprep.mubr.msk.bf16.mxu1 %vm958_vm1, %v957_v1 }
  0xf0   :  { %v121_v11 = vpop.f32.mrb[0].mxu1 }
  0xf1   :  { %v123_v12 = vpop.f32.mrb[1].mxu1  ;;  %v760_v17 = vpack.c.bf16 %v121_v11, %v121_v11 }
  0xf2   :  { %v762_v13 = vpack.c.bf16 %v123_v12, %v123_v12  ;;  %v125_v14 = vpop.f32.mrb[2].mxu1 }
  0xf3   :  { %v127_v15 = vpop.f32.mrb[3].mxu1  ;;  %v761_v18 = vpack.c.bf16 %v125_v14, %v125_v14 }
  0xf4   :  { %v763_v16 = vpack.c.bf16 %v127_v15, %v127_v15  ;;  %801 = vmatpush3.bf16.xpose.msra.mxu0 %v762_v13 }
  0xf5   :  { %812 = vmatprep.subr.bf16.mxu0 %v957_v1 }
  0xf6   :  { %807 = vmatpush3.bf16.xpose.msra.mxu1 %v763_v16 }
  0xf7   :  { %818 = vmatprep.subr.bf16.mxu1 %v957_v1 }
  0xf8   :  { %v164_v19 = vpop.f32.mrb[4].mxu1 }
  0xf9   :  { %v764_v20 = vpack.c.bf16 %v164_v19, %v164_v19  ;;  %v798_v21 = vpop.f32.mrb[5].mxu1 }
  0xfa   :  { %v167_v22 = vpop.f32.mrb[6].mxu1 }
  0xfb   :  { %803 = vmatmul.mubr.bf16.vlgmr.msra.gmra.mrb[0].mxu0 %v760_v17  ;;  %v305_v23 = vsel %vm303_vm2, %v764_v20, 0  ;;  %v765_v24 = vpack.c.bf16 %v167_v22, %v167_v22  ;;  %v799_v25 = vpop.f32.mrb[7].mxu1 }
  0xfc   :  { %814 = vmatprep.mubr.msk.bf16.mxu0 %vm958_vm1, %v957_v1  ;;  %813 = vmatpush3.bf16.msra.mxu0 %v305_v23 }
  0xfd   :  { %809 = vmatmul.mubr.bf16.vlgmr.msra.gmra.mrb[8].mxu1 %v761_v18  ;;  %v351_v26 = vsel %vm303_vm2, %v765_v24, 0  ;;  %824 = vmatprep.subr.bf16.mxu0 %v957_v1 }
  0xfe   :  { %820 = vmatprep.mubr.msk.bf16.mxu1 %vm958_vm1, %v957_v1  ;;  %819 = vmatpush3.bf16.msra.mxu1 %v351_v26 }
  0xff   :  { %844 = vmatprep.subr.bf16.mxu1 %v957_v1 }
 0x1ce   :  { %v227_v27 = vpop.f32.mrb[0].mxu0 }
 0x1cf   :  { %v273_v28 = vmul.f32 0.25, %v227_v27  ;;  %v804_v29 = vpop.f32.mrb[1].mxu0 }
 0x1d0   :  { %v230_v30 = vpop.f32.mrb[2].mxu0  ;;  %v267_v31 = vpop.f32.mrb[8].mxu1  ;;  %v885_v29 = vld [vmem:[%s1159_s3] sm:$0xff]  }
 0x1d1   :  { %v274_v32 = vmul.f32 0.25, %v267_v31  ;;  %v805_v33 = vpop.f32.mrb[3].mxu0  ;;  %v810_v34 = vpop.f32.mrb[9].mxu1  ;;  %v276_v35 = vsel %vm275_vm3, %v273_v28, -inf  ;;  %v886_v30 = vld [vmem:[%s1159_s3 + $0x8] sm:$0xff]   ;;  %s959_s3 = smov [#allocation5]  }
 0x1d2   :  { %277 = vmax.xlane.f32.xlu0 %v276_v35  ;;  %v270_v36 = vpop.f32.mrb[10].mxu1  ;;  %v527_v33 = vlaneseq }
 0x1d3   :  { %v811_v37 = vpop.f32.mrb[11].mxu1  ;;  %v279_v38 = vsel %vm275_vm3, %v274_v32, -inf }
 0x1d6   :  { %280 = vmax.xlane.f32.xlu0 %v279_v38  ;;  %v1114_v38 = vshrl.u32 %v527_v33, 7 }
 0x25f   :  { %v278_v39 = vpop.xlane.xlu0 %277 }
 0x260   :  { %v282_v40 = vsub.f32 %v273_v28, %v278_v39  ;;  %v529_v39 = vsub.s32 2, %v1114_v38 }
 0x262   :  { %v284_v41 = vmul.f32 1.442695, %v282_v40  ;;  %v1120_v40 = vld [vmem:[%s1161_s5] sm:$0xff]  ;;  %s718_s5 = sshll.u32 %s959_s3, 4  ;;  %s719_s5 = int_to_ptr.vmem [resolvable:$true] %s718_s5 }
 0x263   :  { %v281_v42 = vpop.xlane.xlu0 %280  ;;  %s927_s20 = scalar_lea.vmem %s719_s5, 256  ;;  %p932_p9 = scmp.lt.s32.totalorder %s719_s5, %s719_s5 }
 0x264   :  { %889 = vpow2.f32 %v284_v41  ;;  %v283_v43 = vsub.f32 %v274_v32, %v281_v42  ;;  %v530_v41 = vrot.slane %v1120_v40, %v529_v39  ;;  %v535_v42 = vsub.s32 3, %v1114_v38  ;;  %p928_p8 = scmp.ne.s32.totalorder %s719_s5, %s927_s20  ;;  %p933_p10 = scmp.lt.s32.totalorder %s927_s20, %s927_s20 }
 0x266   :  { %v286_v44 = vmul.f32 1.442695, %v283_v43  ;;  %p934_p11 = por %p933_p10, %p932_p9 }
 0x268   :  { %891 = vpow2.f32 %v286_v44  ;;  %p935_p12 = pnand %p934_p11, %p928_p8 }
 0x26e   :  { %v890_v45 = vpop.eup %889 }
 0x26f   :  { %v288_v46 = vsel %vm275_vm3, %v890_v45, 0.0 }
 0x270   :  { %289 = vadd.xlane.f32.xlu1 %v288_v46 }
 0x272   :  { %v892_v47 = vpop.eup %891 }
 0x273   :  { %v291_v48 = vsel %vm275_vm3, %v892_v47, 0.0 }
 0x274   :  { %292 = vadd.xlane.f32.xlu1 %v291_v48  ;;  %v536_v48 = vrot.slane %v1120_v40, %v535_v42 }
 0x2fd   :  { %v290_v49 = vpop.xlane.xlu1 %289 }
 0x2fe   :  { %893 = vrcp.f32 %v290_v49 }
 0x301   :  { %v293_v50 = vpop.xlane.xlu1 %292 }
 0x302   :  { %895 = vrcp.f32 %v293_v50 }
 0x308   :  { %v894_v51 = vpop.eup %893 }
 0x309   :  { %v295_v52 = vmul.f32 %v894_v51, %v890_v45 }
 0x30b   :  { %v298_v54 = vpack.c.bf16 %v295_v52, %v295_v52 }
 0x30c   :  { %v896_v55 = vpop.eup %895 }
 0x30d   :  { %v297_v56 = vmul.f32 %v896_v55, %v892_v47  ;;  %815 = vmatmul.mubr.msk.bf16.vlgmr.msra.gmra.mrb[4].mxu0 %vm275_vm3, %v298_v54  ;;  %v888_v54 = vld [vmem:[#allocation2 + $0x8] sm:$0xff]   ;;  %v546_v55 = vsub.s32 0, %v1114_v38 }
 0x30e   :  { %825 = vmatpush3.bf16.msra.mxu0 %v877_v53  ;;  %840 = vmatprep.mubr.msk.bf16.mxu0 %vm958_vm1, %v957_v1  ;;  %v887_v53 = vld [vmem:[#allocation2] sm:$0xff]  }
 0x30f   :  { %v299_v58 = vpack.c.bf16 %v297_v56, %v297_v56  ;;  %826 = vmatprep.subr.bf16.mxu0 %v957_v1  ;;  %v547_v56 = vrot.slane %v1120_v40, %v546_v55 }
 0x311   :  { %821 = vmatmul.mubr.msk.bf16.vlgmr.msra.gmra.mrb[12].mxu1 %vm275_vm3, %v299_v58 }
 0x312   :  { %827 = vmatpush3.bf16.msra.mxu0 %v878_v57  ;;  %848 = vmatprep.mubr.msk.bf16.mxu1 %vm958_vm1, %v957_v1 }
 0x313   :  { %828 = vmatprep.subr.bf16.mxu0 %v957_v1  ;;  %845 = vmatpush3.bf16.msra.mxu1 %v885_v29 }
 0x314   :  { %846 = vmatprep.subr.bf16.mxu1 %v957_v1 }
 0x316   :  { %829 = vmatpush3.bf16.msra.mxu0 %v879_v59 }
 0x317   :  { %830 = vmatprep.subr.bf16.mxu0 %v957_v1  ;;  %847 = vmatpush3.bf16.msra.mxu1 %v886_v30  ;;  %v701_v30 = vsub.s32 4, %v1114_v38 }
 0x318   :  { %852 = vmatprep.subr.bf16.mxu1 %v957_v1 }
 0x31a   :  { %831 = vmatpush3.bf16.msra.mxu0 %v880_v60 }
 0x31b   :  { %832 = vmatprep.subr.bf16.mxu0 %v957_v1 }
 0x31e   :  { %833 = vmatpush3.bf16.msra.mxu0 %v881_v61 }
 0x31f   :  { %834 = vmatprep.subr.bf16.mxu0 %v957_v1 }
 0x322   :  { %835 = vmatpush3.bf16.msra.mxu0 %v882_v62 }
 0x323   :  { %836 = vmatprep.subr.bf16.mxu0 %v957_v1 }
 0x326   :  { %837 = vmatpush3.bf16.msra.mxu0 %v883_v63 }
 0x327   :  { %838 = vmatprep.subr.bf16.mxu0 %v957_v1 }
 0x32a   :  { %839 = vmatpush3.bf16.msra.mxu0 %v884_v0 }
 0x3e0   :  { %v341_v2 = vpop.f32.mrb[4].mxu0 }
 0x3e1   :  { %v816_v3 = vpop.f32.mrb[5].mxu0 }
 0x3e2   :  { %v344_v4 = vpop.f32.mrb[6].mxu0  ;;  %v613_v3 = vsub.s32 1, %v1114_v38 }
 0x3e3   :  { %v817_v5 = vpop.f32.mrb[7].mxu0 }
 0x3e4   :  { %v387_v8 = vpop.f32.mrb[12].mxu1 }
 0x3e5   :  { %v393_v9 = vpack.c.bf16 %v387_v8, %v341_v2  ;;  %v822_v10 = vpop.f32.mrb[13].mxu1 }
 0x3e6   :  { %v390_v11 = vpop.f32.mrb[14].mxu1 }
 0x3e7   :  { %v823_v12 = vpop.f32.mrb[15].mxu1  ;;  %841 = vmatmul.mubr.bf16.vlgmr.msra.gmra.mrb[8].mxu0 %v393_v9 }
 0x4ba   :  { %v492_v13 = vpop.f32.mrb[8].mxu0 }
 0x4bb   :  { %v499_v14 = vadd.f32 %v492_v13, %v1025_v6  ;;  %v842_v15 = vpop.f32.mrb[9].mxu0 }
 0x4bc   :  { %v495_v16 = vpop.f32.mrb[10].mxu0 }
 0x4bd   :  { %v500_v17 = vadd.f32 %v495_v16, %v1030_v7  ;;  %v843_v18 = vpop.f32.mrb[11].mxu0  ;;  %v501_v19 = vsel %vm83_vm0, %v499_v14, 0.0 }
 0x4be   :  { %502 = vadd.xlane.f32.xlu0 %v501_v19 }
 0x4bf   :  { %v504_v20 = vsel %vm83_vm0, %v500_v17, 0.0 }
 0x4c0   :  { %505 = vadd.xlane.f32.xlu1 %v504_v20 }
 0x54b   :  { %v503_v21 = vpop.xlane.xlu0 %502 }
 0x54c   :  { %v507_v22 = vmul.f32 0.03125, %v503_v21 }
 0x54d   :  { %v506_v23 = vpop.xlane.xlu1 %505 }
 0x54e   :  { %v509_v24 = vsub.f32 %v499_v14, %v507_v22  ;;  %v508_v25 = vmul.f32 0.03125, %v506_v23 }
 0x550   :  { %v510_v26 = vsub.f32 %v500_v17, %v508_v25  ;;  %v511_v27 = vmul.f32 %v509_v24, %v509_v24 }
 0x552   :  { %v513_v6 = vsel %vm83_vm0, %v511_v27, 0.0  ;;  %v512_v28 = vmul.f32 %v510_v26, %v510_v26 }
 0x553   :  { %514 = vadd.xlane.f32.xlu0 %v513_v6 }
 0x554   :  { %v516_v7 = vsel %vm83_vm0, %v512_v28, 0.0 }
 0x555   :  { %517 = vadd.xlane.f32.xlu1 %v516_v7 }
 0x5e0   :  { %v515_v31 = vpop.xlane.xlu0 %514 }
 0x5e1   :  { %v519_v32 = vmul.f32 0.03125, %v515_v31  ;;  %v707_v31 = vsub.s32 5, %v1114_v38 }
 0x5e2   :  { %v518_v34 = vpop.xlane.xlu1 %517 }
 0x5e3   :  { %v521_v35 = vadd.f32 1e-05, %v519_v32  ;;  %v520_v36 = vmul.f32 0.03125, %v518_v34  ;;  %v702_v32 = vrot.slane %v1120_v40, %v701_v30 }
 0x5e5   :  { %897 = vrsqrt.f32 %v521_v35  ;;  %v522_v37 = vadd.f32 1e-05, %v520_v36  ;;  %v708_v35 = vrot.slane %v1120_v40, %v707_v31 }
 0x5e7   :  { %899 = vrsqrt.f32 %v522_v37 }
 0x5ef   :  { %v898_v43 = vpop.eup %897 }
 0x5f0   :  { %v525_v44 = vmul.f32 %v898_v43, %v509_v24 }
 0x5f1   :  { %v900_v45 = vpop.eup %899 }
 0x5f2   :  { %v531_v46 = vmul.f32 %v530_v41, %v525_v44  ;;  %v526_v47 = vmul.f32 %v900_v45, %v510_v26 }
 0x5f4   :  { %v532_v49 = vmul.f32 %v530_v41, %v526_v47  ;;  %v537_v50 = vadd.f32 %v536_v48, %v531_v46 }
 0x5f6   :  { %v538_v51 = vadd.f32 %v536_v48, %v532_v49 }
 0x5f8   :  { %v539_v52 = vpack.c.bf16 %v538_v51, %v537_v50 }
 0x5fa   :  { %849 = vmatmul.mubr.msk.bf16.vlgmr.msra.gmra.mrb[16].mxu1 %vm83_vm0, %v539_v52 }
 0x5fb   :  { %856 = vmatprep.mubr.msk.bf16.mxu1 %vm958_vm1, %v957_v1  ;;  %853 = vmatpush3.bf16.msra.mxu1 %v887_v53 }
 0x5fc   :  { %854 = vmatprep.subr.bf16.mxu1 %v957_v1  ;;  %v614_v1 = vrot.slane %v1120_v40, %v613_v3 }
 0x5ff   :  { %855 = vmatpush3.bf16.msra.mxu1 %v888_v54 }
 0x6cd   :  { %v597_v57 = vpop.f32.mrb[16].mxu1 }
 0x6ce   :  { %v598_v58 = vadd.f32 %v597_v57, %v547_v56  ;;  %v850_v59 = vpop.f32.mrb[17].mxu1 }
 0x6cf   :  { %v600_v60 = vpop.f32.mrb[18].mxu1 }
 0x6d0   :  { %v601_v61 = vadd.f32 %v600_v60, %v547_v56  ;;  %v851_v62 = vpop.f32.mrb[19].mxu1  ;;  %v604_v63 = vmax.f32 %v598_v58, 0.0 }
 0x6d2   :  { %v605_v0 = vmax.f32 %v601_v61, 0.0 }
 0x6d4   :  { %v606_v2 = vpack.c.bf16 %v605_v0, %v604_v63 }
 0x6d6   :  { %857 = vmatmul.mubr.msk.bf16.vlgmr.msra.gmra.mrb[20].mxu1 %vm83_vm0, %v606_v2 }
 0x7a9   :  { %v664_v4 = vpop.f32.mrb[20].mxu1 }
 0x7aa   :  { %v665_v5 = vadd.f32 %v664_v4, %v614_v1  ;;  %v858_v8 = vpop.f32.mrb[21].mxu1 }
 0x7ab   :  { %v667_v9 = vpop.f32.mrb[22].mxu1 }
 0x7ac   :  { %v668_v10 = vadd.f32 %v667_v9, %v614_v1  ;;  %v859_v11 = vpop.f32.mrb[23].mxu1  ;;  %v671_v12 = vadd.f32 %v665_v5, %v537_v50 }
 0x7ae   :  { %v673_v13 = vsel %vm83_vm0, %v671_v12, 0.0  ;;  %v672_v14 = vadd.f32 %v668_v10, %v538_v51 }
 0x7af   :  { %674 = vadd.xlane.f32.xlu0 %v673_v13 }
 0x7b0   :  { %v676_v15 = vsel %vm83_vm0, %v672_v14, 0.0 }
 0x7b1   :  { %677 = vadd.xlane.f32.xlu1 %v676_v15 }
 0x83c   :  { %v675_v16 = vpop.xlane.xlu0 %674 }
 0x83d   :  { %v679_v17 = vmul.f32 0.03125, %v675_v16 }
 0x83e   :  { %v678_v18 = vpop.xlane.xlu1 %677 }
 0x83f   :  { %v681_v19 = vsub.f32 %v671_v12, %v679_v17  ;;  %v680_v20 = vmul.f32 0.03125, %v678_v18 }
 0x841   :  { %v682_v21 = vsub.f32 %v672_v14, %v680_v20  ;;  %v683_v22 = vmul.f32 %v681_v19, %v681_v19 }
 0x843   :  { %v685_v23 = vsel %vm83_vm0, %v683_v22, 0.0  ;;  %v684_v24 = vmul.f32 %v682_v21, %v682_v21 }
 0x844   :  { %686 = vadd.xlane.f32.xlu0 %v685_v23 }
 0x845   :  { %v688_v25 = vsel %vm83_vm0, %v684_v24, 0.0 }
 0x846   :  { %689 = vadd.xlane.f32.xlu1 %v688_v25 }
 0x8d1   :  { %v687_v26 = vpop.xlane.xlu0 %686 }
 0x8d2   :  { %v691_v27 = vmul.f32 0.03125, %v687_v26 }
 0x8d3   :  { %v690_v6 = vpop.xlane.xlu1 %689 }
 0x8d4   :  { %v693_v28 = vadd.f32 1e-05, %v691_v27  ;;  %v692_v7 = vmul.f32 0.03125, %v690_v6 }
 0x8d6   :  { %901 = vrsqrt.f32 %v693_v28  ;;  %v694_v29 = vadd.f32 1e-05, %v692_v7 }
 0x8d8   :  { %903 = vrsqrt.f32 %v694_v29 }
 0x8e0   :  { %v902_v33 = vpop.eup %901 }
 0x8e1   :  { %v697_v34 = vmul.f32 %v902_v33, %v681_v19 }
 0x8e2   :  { %v904_v36 = vpop.eup %903 }
 0x8e3   :  { %v703_v37 = vmul.f32 %v702_v32, %v697_v34  ;;  %v698_v39 = vmul.f32 %v904_v36, %v682_v21 }
 0x8e5   :  { %v704_v41 = vmul.f32 %v702_v32, %v698_v39  ;;  %v709_v42 = vadd.f32 %v708_v35, %v703_v37 }
 0x8e7   :  { %v710_v43 = vadd.f32 %v708_v35, %v704_v41  ;;  %711 = vst.msk [vmem:[#allocation5] sm:$0xff] %vm83_vm0, %v709_v42 }
 0x8e9   :  { %712 = vst.msk [vmem:[#allocation5 + $0x8] sm:$0xff] %vm83_vm0, %v710_v43 }
 0x8ea   :  { %938 = shalt.err (!%p935_p12)
}
 0x8eb   :  { %s939_s23 = scalar_lea.hbm %s1162_s6, 256 }
 0x8ec   :  { %p940_p13 = scmp.ne.s32.totalorder %s1162_s6, %s939_s23  ;;  %p943_p0 = scmp.lt.u32.totalorder %s939_s23, %s1162_s6 }
 0x8ee   :  { %p945_p1 = pnand %p943_p0, %p940_p13 }
 0x8f0   :  { %948 = shalt.err (!%p945_p1)
}
 0x8f1   :  { %s960_s26 = smov 128   ;;  %s961_s27 = smov 8  }
 0x8f2   :  { %724 = dma.vmem_to_hbm [thread:$0]  %s719_s5, 256, %s1162_s6, [#allocation4], %s960_s26, %s960_s26, %s961_s27  }
 0x8f3   :  { %951 = dma.done.wait [#allocation4], 256  }
 0x8f4   :  { %952 = vsyncadd [#allocation4], 4294967040 }
 0x8f5   :  { %728 = vsyncpa [#allocation3], 1 }
 0x8f6   :  { %729 = vsyncpa [#allocation4], 1 }

</bundles_post_ra>
